<compile_context>
chip_gen: v7x
topology: tpu7x:2x2x1
jax: 0.10.0
libtpu: 0.0.40
codegen_flags: <defaults>
</compile_context>

<pallas_src>
import functools
import math

import jax
import jax.numpy as jnp
from jax.experimental import pallas as pl
from jax.experimental.pallas import tpu as pltpu


def _round_up(a: int, b: int) -> int:
    return pl.cdiv(a, b) * b


# --------------------------------------------------------------------------- kernel
def emission_mlp_kernel(x_ref, w_ref, b_ref, o_ref):
    # Cast x to the (bf16) weight dtype in VMEM (VPU op, kernel is DMA-bound anyway),
    # single fused MXU matmul with f32 accumulation, f32 bias add, cast on store.
    x = x_ref[...].astype(w_ref.dtype)
    y = jnp.dot(x, w_ref[...], preferred_element_type=jnp.float32)
    o_ref[...] = (y + b_ref[...]).astype(o_ref.dtype)


# ------------------------------------------------------------- parameter preprocessing
def _derive_pack(in_size: int, out_size: int, itemsize: int,
                 min_pack: int = 16, max_weight_bytes: int = 8 << 20) -> int:
    """Smallest PACK making PACK*in_size and PACK*out_size multiples of 128 (lane-dense),
    at least `min_pack` (bf16 (16,128) tile / 256-wide MXU). Falls back to 1 if the
    block-diagonal weight would get too large (kernel stays correct, just masked stores)."""
    if in_size % 128 == 0 and out_size % 128 == 0:
        return 1
    step = math.lcm(128 // math.gcd(128, in_size), 128 // math.gcd(128, out_size))
    pack = step * pl.cdiv(min_pack, step)
    if pack * in_size * pack * out_size * itemsize > max_weight_bytes:
        return 1
    return pack


def prepare_emission_mlp_params(w1, b1, w2, b2, *, use_bf16: bool = True):
    """Hoisted, call once at model load.  Returns (w_bd, b_bd).

    w1: [input_size, hidden_size]   b1: [1, hidden_size]
    w2: [hidden_size, out_size]     b2: [1, out_size]
    """
    in_size = w1.shape[0]
    out_size = w2.shape[1]
    w1f = w1.astype(jnp.float32)
    w2f = w2.astype(jnp.float32)
    b1f = b1.reshape(1, -1).astype(jnp.float32)
    b2f = b2.reshape(1, -1).astype(jnp.float32)

    # Algebraic fusion of the two Linears (exact: dropout==identity, no nonlinearity).
    w_fused = w1f @ w2f                 # [in, out]
    b_fused = b1f @ w2f + b2f           # [1, out]

    w_itemsize = 2 if use_bf16 else 4
    pack = _derive_pack(in_size, out_size, w_itemsize)

    # Lane-dense row packing: 8/16 consecutive rows share one lane tile via kron(I, W).
    w_bd = jnp.kron(jnp.eye(pack, dtype=jnp.float32), w_fused)    # [pack*in, pack*out]
    b_bd = jnp.tile(b_fused, (1, pack))                           # [1, pack*out]
    if use_bf16:
        w_bd = w_bd.astype(jnp.bfloat16)
    return w_bd, b_bd


# ---------------------------------------------------------------------------- forward
@functools.partial(jax.jit,
                   static_argnames=("tm_max_rows", "out_dtype", "vmem_budget_bytes"))
def emission_mlp_forward(x, w_bd, b_bd, *,
                         tm_max_rows: int = 32768,
                         out_dtype=None,
                         vmem_budget_bytes: int = 24 << 20):
    """Inference forward of emission_mlp.

    x   : [M, input_size]  (batch*seq flattened into M, row-major)
    w_bd: [PACK*input_size, PACK*out_size]   (from prepare_emission_mlp_params)
    b_bd: [1, PACK*out_size]                 (f32)
    """
    M, in_size = x.shape
    in_p, out_p = w_bd.shape
    PACK = in_p // in_size
    out_size = out_p // PACK
    if out_dtype is None:
        out_dtype = x.dtype

    x_isz = x.dtype.itemsize
    out_isz = jnp.dtype(out_dtype).itemsize
    w_bytes = in_p * out_p * w_bd.dtype.itemsize
    b_bytes = out_p * 4

    # Sublane alignment for the packed-row axis (16 if any bf16 array touches it).
    sub = max(8 * (4 // x_isz), 8 * (4 // out_isz))

    # Cap packed rows per tile by the VMEM budget (double-buffered x + y, resident w/b).
    per_row = 2 * (in_p * x_isz + out_p * out_isz)
    avail = vmem_budget_bytes - 2 * (w_bytes + b_bytes) - (64 << 10)
    cap_p = max(sub, (avail // per_row) // sub * sub)
    tm_p_max = min(max(tm_max_rows // PACK, sub), cap_p)

    # Padding-bounded tiling: pick grid first, then tm (waste <= sub packed rows/step).
    mp = pl.cdiv(M, PACK)                      # packed rows needed
    mp_aligned = _round_up(mp, sub)
    grid_m = pl.cdiv(mp_aligned, tm_p_max)
    if grid_m == 1 and mp_aligned >= 4 * sub:  # v7x megacore: give both TCs work
        grid_m = 2
    tm_p = _round_up(pl.cdiv(mp_aligned, grid_m), sub)
    mp_pad = grid_m * tm_p
    m_pad = mp_pad * PACK

    if m_pad != M:
        x = jnp.pad(x, ((0, m_pad - M), (0, 0)))
    xp = x.reshape(mp_pad, in_p)               # free, contiguous reshape

    cost = pl.CostEstimate(
        flops=2 * mp_pad * in_p * out_p,
        transcendentals=0,
        bytes_accessed=mp_pad * in_p * x_isz + mp_pad * out_p * out_isz
                       + w_bytes + b_bytes,
    )

    yp = pl.pallas_call(
        emission_mlp_kernel,
        out_shape=jax.ShapeDtypeStruct((mp_pad, out_p), out_dtype),
        grid_spec=pltpu.PrefetchScalarGridSpec(
            num_scalar_prefetch=0,
            grid=(grid_m,),
            in_specs=[
                pl.BlockSpec((tm_p, in_p), lambda i: (i, 0)),   # x tile, double-buffered
                pl.BlockSpec((in_p, out_p), lambda i: (0, 0)),  # fused weight, VMEM-resident
                pl.BlockSpec((1, out_p), lambda i: (0, 0)),     # fused bias, VMEM-resident
            ],
            out_specs=pl.BlockSpec((tm_p, out_p), lambda i: (i, 0)),
        ),
        compiler_params=pltpu.CompilerParams(
            dimension_semantics=("parallel",),   # independent row tiles -> 2-TC on v7x
            vmem_limit_bytes=32 * 1024 * 1024,   # safe on v5e/v6e/v7x; >= working set
        ),
        cost_estimate=cost,
    )(xp, w_bd, b_bd)

    y = yp.reshape(m_pad, out_size)              # free, contiguous reshape
    if m_pad != M:                               # slice copy only when padding was needed
        y = y[:M]
    return y


# ------------------------------------------------------------------------------- test
if __name__ == "__main__":
    # Small shapes consistent with the module: batch=2, seq=8 -> M=16 rows.
    batch, seq = 2, 8
    input_size, hidden_size, out_size = 32, 64, 16
    M = batch * seq

    key = jax.random.PRNGKey(0)
    kx, kw1, kb1, kw2, kb2 = jax.random.split(key, 5)

    # Deterministic synthetic parameters (PyTorch Linear shapes, stored transposed: [in, out]).
    x = jax.random.normal(kx, (batch, seq, input_size), dtype=jnp.float32)
    w1 = jax.random.normal(kw1, (input_size, hidden_size), dtype=jnp.float32) * 0.05
    b1 = jax.random.normal(kb1, (1, hidden_size), dtype=jnp.float32) * 0.05
    w2 = jax.random.normal(kw2, (hidden_size, out_size), dtype=jnp.float32) * 0.05
    b2 = jax.random.normal(kb2, (1, out_size), dtype=jnp.float32) * 0.05

    x_flat = x.reshape(M, input_size)

    # Pure-JAX reference of the (unfused) PyTorch forward at inference.
    ref = (x_flat @ w1 + b1) @ w2 + b2

    # 1) f32-operand path: must match the unfused reference tightly.
    params_f32 = prepare_emission_mlp_params(w1, b1, w2, b2, use_bf16=False)
    y_f32 = emission_mlp_forward(x_flat, *params_f32)
    jax.block_until_ready(y_f32)
    assert jnp.allclose(y_f32, ref, atol=1e-4, rtol=1e-4), "f32 path mismatch vs reference"

    # 2) Default fast path (bf16 MXU operands, f32 accumulate): looser tolerance.
    params = prepare_emission_mlp_params(w1, b1, w2, b2, use_bf16=True)
    y_flat = emission_mlp_forward(x_flat, *params)
    y = y_flat.reshape(batch, seq, out_size)
    jax.block_until_ready(y)
    assert jnp.allclose(y_flat, ref, atol=2e-2, rtol=2e-2), "bf16 path mismatch vs reference"

    print("KERNEL_OK")
</pallas_src>

<mosaic_0001>
module attributes {stable_mosaic.version = 11 : i64} {
  func.func @emission_mlp_kernel(%arg0: i32, %arg1: memref<8x512xf32, #tpu.memory_space<vmem>>, %arg2: memref<512x256xf32, #tpu.memory_space<vmem>>, %arg3: memref<1x256xf32, #tpu.memory_space<vmem>>, %arg4: memref<8x256xf32, #tpu.memory_space<vmem>>) attributes {dimension_semantics = [#tpu.dimension_semantics<parallel>], iteration_bounds = array<i64: 1>, scalar_prefetch = 0 : i64, scratch_operands = 0 : i64, tpu.core_type = #tpu.core_type<tc>, window_params = [{transform_indices = @transform_0, window_bounds = array<i64: 8, 512>}, {pipeline_mode = #tpu.pipeline_mode<synchronous>, transform_indices = @transform_1, window_bounds = array<i64: 512, 256>}, {pipeline_mode = #tpu.pipeline_mode<synchronous>, transform_indices = @transform_2, window_bounds = array<i64: 1, 256>}, {transform_indices = @transform_3, window_bounds = array<i64: 8, 256>}]} {
    %c0 = arith.constant 0 : index
    %c0_0 = arith.constant 0 : index
    %0 = vector.load %arg1[%c0, %c0_0] : memref<8x512xf32, #tpu.memory_space<vmem>>, vector<8x512xf32>
    %c0_1 = arith.constant 0 : index
    %c0_2 = arith.constant 0 : index
    %1 = vector.load %arg2[%c0_1, %c0_2] : memref<512x256xf32, #tpu.memory_space<vmem>>, vector<512x256xf32>
    %cst = arith.constant dense<0.000000e+00> : vector<8x256xf32>
    %2 = tpu.matmul %0, %1, %cst {dimension_numbers = #tpu.dot_dimension_numbers<[1], [0], [0], [1], [0, 0, 1, 1], [], []>} : vector<8x512xf32>, vector<512x256xf32>, vector<8x256xf32> -> vector<8x256xf32>
    %c0_3 = arith.constant 0 : index
    %c0_4 = arith.constant 0 : index
    %3 = vector.load %arg3[%c0_3, %c0_4] : memref<1x256xf32, #tpu.memory_space<vmem>>, vector<1x256xf32>
    %4 = vector.broadcast %3 : vector<1x256xf32> to vector<8x256xf32>
    %5 = arith.addf %2, %4 : vector<8x256xf32>
    %c0_5 = arith.constant 0 : index
    %c0_6 = arith.constant 0 : index
    %6 = vector.load %arg4[%c0_5, %c0_6] : memref<8x256xf32, #tpu.memory_space<vmem>>, vector<8x256xf32>
    tpu.vector_store %arg4[%c0_5, %c0_6], %5 {strides = array<i32>} : memref<8x256xf32, #tpu.memory_space<vmem>>, vector<8x256xf32>,
    return
  }
  func.func @transform_0(%arg0: i32) -> (i32, i32) {
    %c0_i32 = arith.constant 0 : i32
    %c0_i32_0 = arith.constant 0 : i32
    return %arg0, %c0_i32 : i32, i32
  }
  func.func @transform_1(%arg0: i32) -> (i32, i32) {
    %c0_i32 = arith.constant 0 : i32
    %c0_i32_0 = arith.constant 0 : i32
    %c0_i32_1 = arith.constant 0 : i32
    return %c0_i32, %c0_i32_0 : i32, i32
  }
  func.func @transform_2(%arg0: i32) -> (i32, i32) {
    %c0_i32 = arith.constant 0 : i32
    %c0_i32_0 = arith.constant 0 : i32
    %c0_i32_1 = arith.constant 0 : i32
    return %c0_i32, %c0_i32_0 : i32, i32
  }
  func.func @transform_3(%arg0: i32) -> (i32, i32) {
    %c0_i32 = arith.constant 0 : i32
    %c0_i32_0 = arith.constant 0 : i32
    return %arg0, %c0_i32 : i32, i32
  }
}

</mosaic_0001>

<bundles_post_ra>
// kernel: emission_mlp_forward.1
= control target key start
LH: loop header
LB: loop body
LE: loop exit
PB: predicated region body
PF: predicated region fallthrough
CT: control target
= control target key end

     0   :  { %8 = vsyncpa [#allocation3], 0  ;;  %s480_s12 = smov [#allocation2]   ;;  %s536_s0 = inlined_call_operand.vmem [shape: f32[8,512], index: 0, kind: input, shape index: {}]   ;;  %s537_s1 = inlined_call_operand.hbm [shape: f32[512,256], index: 1, kind: input, shape index: {}]   ;;  %s538_s2 = inlined_call_operand.vmem [shape: f32[1,256], index: 2, kind: input, shape index: {}]   ;;  %s539_s3 = inlined_call_operand.vmem [shape: f32[8,256], index: 3, kind: output, shape index: {}]  }
   0x1   :  { %s16_s13 = sshll.u32 %s480_s12, 4  ;;  %s456_s16 = scalar_lea.hbm %s537_s1, 16384  ;;  %s17_s13 = int_to_ptr.vmem [resolvable:$true] %s16_s13 }
   0x2   :  { %p457_p0 = scmp.ne.s32.totalorder %s537_s1, %s456_s16  ;;  %p460_p1 = scmp.lt.u32.totalorder %s456_s16, %s537_s1 }
   0x4   :  { %p462_p2 = pnand %p460_p1, %p457_p0 }
   0x6   :  { %465 = shalt.err (!%p462_p2)
}
   0x7   :  { %s466_s21 = scalar_lea.vmem %s17_s13, 16384  ;;  %p471_p4 = scmp.lt.s32.totalorder %s17_s13, %s17_s13 }
   0x8   :  { %p467_p3 = scmp.ne.s32.totalorder %s17_s13, %s466_s21  ;;  %p472_p5 = scmp.lt.s32.totalorder %s466_s21, %s466_s21 }
   0xa   :  { %p473_p6 = por %p472_p5, %p471_p4 }
   0xc   :  { %p474_p7 = pnand %p473_p6, %p467_p3 }
   0xe   :  { %477 = shalt.err (!%p474_p7)
}
   0xf   :  { %s481_s22 = smov 256   ;;  %s482_s23 = smov 16  }
  0x10   :  { %22 = dma.hbm_to_vmem [thread:$0]  %s537_s1, 16384, %s17_s13, [#allocation3], %s481_s22, %s481_s22, %s482_s23  }
  0x11   :  { %478 = dma.done.wait [#allocation3], 16384  }
  0x12   :  { %479 = vsyncadd [#allocation3], 4294950912  ;;  %v33_v0 = vld [vmem:[#allocation2 + $0x8] sm:$0xff]  ;;  %v35_v1 = vld [vmem:[#allocation2 + $0x18] sm:$0xff] }
  0x13   :  { %v32_v2 = vld [vmem:[#allocation2] sm:$0xff]  ;;  %v321_v3 = vpack.c.bf16 %v35_v1, %v33_v0  ;;  %v34_v4 = vld [vmem:[#allocation2 + $0x10] sm:$0xff]  ;;  %v97_v5 = vld [vmem:[#allocation2 + $0x208] sm:$0xff] }
  0x14   :  { %v99_v6 = vld [vmem:[#allocation2 + $0x218] sm:$0xff]  ;;  %v323_v7 = vpack.c.bf16 %v34_v4, %v32_v2  ;;  %v96_v9 = vld [vmem:[#allocation2 + $0x200] sm:$0xff]  ;;  %v98_v10 = vld [vmem:[#allocation2 + $0x210] sm:$0xff] }
  0x15   :  { %v385_v8 = vpack.c.bf16 %v99_v6, %v97_v5  ;;  %v37_v11 = vld [vmem:[#allocation2 + $0x28] sm:$0xff]  ;;  %322 = vmatprep.subr.bf16.mxu1 %v321_v3  ;;  %v387_v12 = vpack.c.bf16 %v98_v10, %v96_v9  ;;  %v39_v13 = vld [vmem:[#allocation2 + $0x38] sm:$0xff]  ;;  %v36_v14 = vld [vmem:[#allocation2 + $0x20] sm:$0xff] }
  0x16   :  { %v38_v15 = vld [vmem:[#allocation2 + $0x30] sm:$0xff]  ;;  %324 = vmatpush1.bf16.msra.mxu1 %v323_v7  ;;  %v325_v16 = vpack.c.bf16 %v39_v13, %v37_v11  ;;  %v101_v18 = vld [vmem:[#allocation2 + $0x228] sm:$0xff]  ;;  %v103_v19 = vld [vmem:[#allocation2 + $0x238] sm:$0xff] }
  0x17   :  { %386 = vmatprep.subr.bf16.mxu0 %v385_v8  ;;  %v327_v17 = vpack.c.bf16 %v38_v15, %v36_v14  ;;  %v100_v20 = vld [vmem:[#allocation2 + $0x220] sm:$0xff]  ;;  %v389_v21 = vpack.c.bf16 %v103_v19, %v101_v18  ;;  %v102_v22 = vld [vmem:[#allocation2 + $0x230] sm:$0xff]  ;;  %v41_v23 = vld [vmem:[#allocation2 + $0x48] sm:$0xff] }
  0x18   :  { %388 = vmatpush1.bf16.msra.mxu0 %v387_v12  ;;  %v43_v24 = vld [vmem:[#allocation2 + $0x58] sm:$0xff]  ;;  %326 = vmatprep.subr.bf16.mxu1 %v325_v16  ;;  %v391_v25 = vpack.c.bf16 %v102_v22, %v100_v20  ;;  %v40_v27 = vld [vmem:[#allocation2 + $0x40] sm:$0xff]  ;;  %v42_v28 = vld [vmem:[#allocation2 + $0x50] sm:$0xff] }
  0x19   :  { %v329_v26 = vpack.c.bf16 %v43_v24, %v41_v23  ;;  %v105_v29 = vld [vmem:[#allocation2 + $0x248] sm:$0xff]  ;;  %390 = vmatprep.subr.bf16.mxu0 %v389_v21  ;;  %v107_v30 = vld [vmem:[#allocation2 + $0x258] sm:$0xff]  ;;  %v104_v31 = vld [vmem:[#allocation2 + $0x240] sm:$0xff]  ;;  %v331_v33 = vpack.c.bf16 %v42_v28, %v40_v27 }
  0x1a   :  { %v106_v32 = vld [vmem:[#allocation2 + $0x250] sm:$0xff]  ;;  %328 = vmatpush1.bf16.msra.mxu1 %v327_v17  ;;  %v393_v34 = vpack.c.bf16 %v107_v30, %v105_v29  ;;  %v45_v35 = vld [vmem:[#allocation2 + $0x68] sm:$0xff]  ;;  %v47_v36 = vld [vmem:[#allocation2 + $0x78] sm:$0xff] }
  0x1b   :  { %v44_v37 = vld [vmem:[#allocation2 + $0x60] sm:$0xff]  ;;  %330 = vmatprep.subr.bf16.mxu1 %v329_v26  ;;  %v395_v38 = vpack.c.bf16 %v106_v32, %v104_v31  ;;  %v333_v39 = vpack.c.bf16 %v47_v36, %v45_v35  ;;  %v46_v40 = vld [vmem:[#allocation2 + $0x70] sm:$0xff]  ;;  %v109_v41 = vld [vmem:[#allocation2 + $0x268] sm:$0xff] }
  0x1c   :  { %392 = vmatpush1.bf16.msra.mxu0 %v391_v25  ;;  %v111_v42 = vld [vmem:[#allocation2 + $0x278] sm:$0xff]  ;;  %v108_v44 = vld [vmem:[#allocation2 + $0x260] sm:$0xff]  ;;  %v110_v45 = vld [vmem:[#allocation2 + $0x270] sm:$0xff]  ;;  %v335_v48 = vpack.c.bf16 %v46_v40, %v44_v37 }
  0x1d   :  { %394 = vmatprep.subr.bf16.mxu0 %v393_v34  ;;  %v397_v43 = vpack.c.bf16 %v111_v42, %v109_v41  ;;  %v49_v46 = vld [vmem:[#allocation2 + $0x88] sm:$0xff]  ;;  %v51_v47 = vld [vmem:[#allocation2 + $0x98] sm:$0xff]  ;;  %v399_v51 = vpack.c.bf16 %v110_v45, %v108_v44  ;;  %v48_v53 = vld [vmem:[#allocation2 + $0x80] sm:$0xff] }
  0x1e   :  { %332 = vmatpush1.bf16.msra.mxu1 %v331_v33  ;;  %v113_v49 = vld [vmem:[#allocation2 + $0x288] sm:$0xff]  ;;  %v115_v50 = vld [vmem:[#allocation2 + $0x298] sm:$0xff]  ;;  %v337_v52 = vpack.c.bf16 %v51_v47, %v49_v46  ;;  %v50_v54 = vld [vmem:[#allocation2 + $0x90] sm:$0xff] }
  0x1f   :  { %334 = vmatprep.subr.bf16.mxu1 %v333_v39  ;;  %v112_v55 = vld [vmem:[#allocation2 + $0x280] sm:$0xff]  ;;  %v401_v56 = vpack.c.bf16 %v115_v50, %v113_v49  ;;  %v114_v57 = vld [vmem:[#allocation2 + $0x290] sm:$0xff]  ;;  %v53_v58 = vld [vmem:[#allocation2 + $0xa8] sm:$0xff]  ;;  %v339_v62 = vpack.c.bf16 %v50_v54, %v48_v53 }
  0x20   :  { %396 = vmatpush1.bf16.msra.mxu0 %v395_v38  ;;  %v55_v59 = vld [vmem:[#allocation2 + $0xb8] sm:$0xff]  ;;  %v117_v60 = vld [vmem:[#allocation2 + $0x2a8] sm:$0xff]  ;;  %v403_v63 = vpack.c.bf16 %v114_v57, %v112_v55  ;;  %v52_v1 = vld [vmem:[#allocation2 + $0xa0] sm:$0xff] }
  0x21   :  { %398 = vmatprep.subr.bf16.mxu0 %v397_v43  ;;  %v119_v61 = vld [vmem:[#allocation2 + $0x2b8] sm:$0xff]  ;;  %v341_v0 = vpack.c.bf16 %v55_v59, %v53_v58  ;;  %v54_v2 = vld [vmem:[#allocation2 + $0xb0] sm:$0xff]  ;;  %v116_v3 = vld [vmem:[#allocation2 + $0x2a0] sm:$0xff] }
  0x22   :  { %336 = vmatpush1.bf16.msra.mxu1 %v335_v48  ;;  %v405_v4 = vpack.c.bf16 %v119_v61, %v117_v60  ;;  %v118_v5 = vld [vmem:[#allocation2 + $0x2b0] sm:$0xff]  ;;  %v57_v6 = vld [vmem:[#allocation2 + $0xc8] sm:$0xff]  ;;  %v59_v7 = vld [vmem:[#allocation2 + $0xd8] sm:$0xff]  ;;  %v343_v10 = vpack.c.bf16 %v54_v2, %v52_v1 }
  0x23   :  { %338 = vmatprep.subr.bf16.mxu1 %v337_v52  ;;  %v121_v8 = vld [vmem:[#allocation2 + $0x2c8] sm:$0xff]  ;;  %v123_v9 = vld [vmem:[#allocation2 + $0x2d8] sm:$0xff]  ;;  %v407_v11 = vpack.c.bf16 %v118_v5, %v116_v3  ;;  %v345_v12 = vpack.c.bf16 %v59_v7, %v57_v6  ;;  %v56_v13 = vld [vmem:[#allocation2 + $0xc0] sm:$0xff] }
  0x24   :  { %400 = vmatpush1.bf16.msra.mxu0 %v399_v51  ;;  %v58_v14 = vld [vmem:[#allocation2 + $0xd0] sm:$0xff]  ;;  %v120_v15 = vld [vmem:[#allocation2 + $0x2c0] sm:$0xff]  ;;  %v409_v16 = vpack.c.bf16 %v123_v9, %v121_v8  ;;  %v61_v18 = vld [vmem:[#allocation2 + $0xe8] sm:$0xff] }
  0x25   :  { %402 = vmatprep.subr.bf16.mxu0 %v401_v56  ;;  %v122_v17 = vld [vmem:[#allocation2 + $0x2d0] sm:$0xff]  ;;  %v63_v19 = vld [vmem:[#allocation2 + $0xf8] sm:$0xff]  ;;  %v125_v20 = vld [vmem:[#allocation2 + $0x2e8] sm:$0xff]  ;;  %v347_v22 = vpack.c.bf16 %v58_v14, %v56_v13 }
  0x26   :  { %340 = vmatpush1.bf16.msra.mxu1 %v339_v62  ;;  %v127_v21 = vld [vmem:[#allocation2 + $0x2f8] sm:$0xff]  ;;  %v411_v23 = vpack.c.bf16 %v122_v17, %v120_v15  ;;  %v349_v24 = vpack.c.bf16 %v63_v19, %v61_v18  ;;  %v60_v25 = vld [vmem:[#allocation2 + $0xe0] sm:$0xff]  ;;  %v62_v26 = vld [vmem:[#allocation2 + $0xf0] sm:$0xff] }
  0x27   :  { %342 = vmatprep.subr.bf16.mxu1 %v341_v0  ;;  %v124_v27 = vld [vmem:[#allocation2 + $0x2e0] sm:$0xff]  ;;  %v413_v28 = vpack.c.bf16 %v127_v21, %v125_v20  ;;  %v126_v29 = vld [vmem:[#allocation2 + $0x2f0] sm:$0xff]  ;;  %v65_v30 = vld [vmem:[#allocation2 + $0x108] sm:$0xff]  ;;  %v351_v34 = vpack.c.bf16 %v62_v26, %v60_v25 }
  0x28   :  { %404 = vmatpush1.bf16.msra.mxu0 %v403_v63  ;;  %v67_v31 = vld [vmem:[#allocation2 + $0x118] sm:$0xff]  ;;  %v129_v32 = vld [vmem:[#allocation2 + $0x308] sm:$0xff]  ;;  %v415_v35 = vpack.c.bf16 %v126_v29, %v124_v27  ;;  %v64_v37 = vld [vmem:[#allocation2 + $0x100] sm:$0xff] }
  0x29   :  { %406 = vmatprep.subr.bf16.mxu0 %v405_v4  ;;  %v131_v33 = vld [vmem:[#allocation2 + $0x318] sm:$0xff]  ;;  %v353_v36 = vpack.c.bf16 %v67_v31, %v65_v30  ;;  %v66_v38 = vld [vmem:[#allocation2 + $0x110] sm:$0xff]  ;;  %v128_v39 = vld [vmem:[#allocation2 + $0x300] sm:$0xff] }
  0x2a   :  { %344 = vmatpush1.bf16.msra.mxu1 %v343_v10  ;;  %v417_v40 = vpack.c.bf16 %v131_v33, %v129_v32  ;;  %v130_v41 = vld [vmem:[#allocation2 + $0x310] sm:$0xff]  ;;  %v69_v42 = vld [vmem:[#allocation2 + $0x128] sm:$0xff]  ;;  %v71_v43 = vld [vmem:[#allocation2 + $0x138] sm:$0xff]  ;;  %v355_v46 = vpack.c.bf16 %v66_v38, %v64_v37 }
  0x2b   :  { %346 = vmatprep.subr.bf16.mxu1 %v345_v12  ;;  %v133_v44 = vld [vmem:[#allocation2 + $0x328] sm:$0xff]  ;;  %v135_v45 = vld [vmem:[#allocation2 + $0x338] sm:$0xff]  ;;  %v419_v47 = vpack.c.bf16 %v130_v41, %v128_v39  ;;  %v357_v48 = vpack.c.bf16 %v71_v43, %v69_v42  ;;  %v68_v49 = vld [vmem:[#allocation2 + $0x120] sm:$0xff] }
  0x2c   :  { %408 = vmatpush1.bf16.msra.mxu0 %v407_v11  ;;  %v70_v50 = vld [vmem:[#allocation2 + $0x130] sm:$0xff]  ;;  %v132_v51 = vld [vmem:[#allocation2 + $0x320] sm:$0xff]  ;;  %v421_v52 = vpack.c.bf16 %v135_v45, %v133_v44  ;;  %v73_v54 = vld [vmem:[#allocation2 + $0x148] sm:$0xff] }
  0x2d   :  { %410 = vmatprep.subr.bf16.mxu0 %v409_v16  ;;  %v134_v53 = vld [vmem:[#allocation2 + $0x330] sm:$0xff]  ;;  %v75_v55 = vld [vmem:[#allocation2 + $0x158] sm:$0xff]  ;;  %v137_v56 = vld [vmem:[#allocation2 + $0x348] sm:$0xff]  ;;  %v359_v58 = vpack.c.bf16 %v70_v50, %v68_v49 }
  0x2e   :  { %348 = vmatpush1.bf16.msra.mxu1 %v347_v22  ;;  %v139_v57 = vld [vmem:[#allocation2 + $0x358] sm:$0xff]  ;;  %v423_v59 = vpack.c.bf16 %v134_v53, %v132_v51  ;;  %v361_v60 = vpack.c.bf16 %v75_v55, %v73_v54  ;;  %v72_v61 = vld [vmem:[#allocation2 + $0x140] sm:$0xff]  ;;  %v74_v62 = vld [vmem:[#allocation2 + $0x150] sm:$0xff] }
  0x2f   :  { %350 = vmatprep.subr.bf16.mxu1 %v349_v24  ;;  %v136_v63 = vld [vmem:[#allocation2 + $0x340] sm:$0xff]  ;;  %v425_v0 = vpack.c.bf16 %v139_v57, %v137_v56  ;;  %v138_v1 = vld [vmem:[#allocation2 + $0x350] sm:$0xff]  ;;  %v77_v2 = vld [vmem:[#allocation2 + $0x168] sm:$0xff]  ;;  %v363_v6 = vpack.c.bf16 %v74_v62, %v72_v61 }
  0x30   :  { %412 = vmatpush1.bf16.msra.mxu0 %v411_v23  ;;  %v79_v3 = vld [vmem:[#allocation2 + $0x178] sm:$0xff]  ;;  %v141_v4 = vld [vmem:[#allocation2 + $0x368] sm:$0xff]  ;;  %v76_v7 = vld [vmem:[#allocation2 + $0x160] sm:$0xff]  ;;  %v427_v8 = vpack.c.bf16 %v138_v1, %v136_v63 }
  0x31   :  { %414 = vmatprep.subr.bf16.mxu0 %v413_v28  ;;  %v143_v5 = vld [vmem:[#allocation2 + $0x378] sm:$0xff]  ;;  %v365_v9 = vpack.c.bf16 %v79_v3, %v77_v2  ;;  %v78_v10 = vld [vmem:[#allocation2 + $0x170] sm:$0xff]  ;;  %v140_v11 = vld [vmem:[#allocation2 + $0x360] sm:$0xff] }
  0x32   :  { %352 = vmatpush1.bf16.msra.mxu1 %v351_v34  ;;  %v142_v12 = vld [vmem:[#allocation2 + $0x370] sm:$0xff]  ;;  %v429_v13 = vpack.c.bf16 %v143_v5, %v141_v4  ;;  %v81_v14 = vld [vmem:[#allocation2 + $0x188] sm:$0xff]  ;;  %v83_v15 = vld [vmem:[#allocation2 + $0x198] sm:$0xff]  ;;  %v367_v20 = vpack.c.bf16 %v78_v10, %v76_v7  ;;  %v162_v4 = vlaneseq }
  0x33   :  { %354 = vmatprep.subr.bf16.mxu1 %v353_v36  ;;  %v29_v16 = vld [vmem:[%s536_s0 + $0x8] sm:$0xff]  ;;  %v147_v18 = vld [vmem:[#allocation2 + $0x398] sm:$0xff]  ;;  %v431_v21 = vpack.c.bf16 %v142_v12, %v140_v11  ;;  %v369_v22 = vpack.c.bf16 %v83_v15, %v81_v14  ;;  %v80_v23 = vld [vmem:[#allocation2 + $0x180] sm:$0xff] }
  0x34   :  { %416 = vmatpush1.bf16.msra.mxu0 %v415_v35  ;;  %v145_v17 = vld [vmem:[#allocation2 + $0x388] sm:$0xff]  ;;  %236 = vmatprep.mubr.f32.mxu1 %v29_v16  ;;  %v31_v19 = vld [vmem:[%s536_s0 + $0x18] sm:$0xff]  ;;  %v82_v24 = vld [vmem:[#allocation2 + $0x190] sm:$0xff]  ;;  %v163_v5 = vshrl.u32 %v162_v4, 7 }
  0x35   :  { %418 = vmatprep.subr.bf16.mxu0 %v417_v40  ;;  %307 = vmatprep.mubr.f32.mxu0 %v31_v19  ;;  %v144_v25 = vld [vmem:[#allocation2 + $0x380] sm:$0xff]  ;;  %v433_v26 = vpack.c.bf16 %v147_v18, %v145_v17  ;;  %v146_v27 = vld [vmem:[#allocation2 + $0x390] sm:$0xff]  ;;  %v85_v28 = vld [vmem:[#allocation2 + $0x1a8] sm:$0xff]  ;;  %v371_v32 = vpack.c.bf16 %v82_v24, %v80_v23 }
  0x36   :  { %356 = vmatpush1.bf16.msra.mxu1 %v355_v46  ;;  %v87_v29 = vld [vmem:[#allocation2 + $0x1b8] sm:$0xff]  ;;  %v149_v30 = vld [vmem:[#allocation2 + $0x3a8] sm:$0xff]  ;;  %v435_v33 = vpack.c.bf16 %v146_v27, %v144_v25  ;;  %v84_v35 = vld [vmem:[#allocation2 + $0x1a0] sm:$0xff] }
  0x37   :  { %358 = vmatprep.subr.bf16.mxu1 %v357_v48  ;;  %v151_v31 = vld [vmem:[#allocation2 + $0x3b8] sm:$0xff]  ;;  %v373_v34 = vpack.c.bf16 %v87_v29, %v85_v28  ;;  %v86_v36 = vld [vmem:[#allocation2 + $0x1b0] sm:$0xff]  ;;  %v148_v37 = vld [vmem:[#allocation2 + $0x3a0] sm:$0xff] }
  0x38   :  { %420 = vmatpush1.bf16.msra.mxu0 %v419_v47  ;;  %v437_v38 = vpack.c.bf16 %v151_v31, %v149_v30  ;;  %v150_v39 = vld [vmem:[#allocation2 + $0x3b0] sm:$0xff]  ;;  %v89_v40 = vld [vmem:[#allocation2 + $0x1c8] sm:$0xff]  ;;  %v91_v41 = vld [vmem:[#allocation2 + $0x1d8] sm:$0xff]  ;;  %v375_v44 = vpack.c.bf16 %v86_v36, %v84_v35 }
  0x39   :  { %422 = vmatprep.subr.bf16.mxu0 %v421_v52  ;;  %v153_v42 = vld [vmem:[#allocation2 + $0x3c8] sm:$0xff]  ;;  %v155_v43 = vld [vmem:[#allocation2 + $0x3d8] sm:$0xff]  ;;  %v439_v45 = vpack.c.bf16 %v150_v39, %v148_v37  ;;  %v377_v46 = vpack.c.bf16 %v91_v41, %v89_v40  ;;  %v88_v47 = vld [vmem:[#allocation2 + $0x1c0] sm:$0xff] }
  0x3a   :  { %360 = vmatpush1.bf16.msra.mxu1 %v359_v58  ;;  %v90_v48 = vld [vmem:[#allocation2 + $0x1d0] sm:$0xff]  ;;  %v152_v49 = vld [vmem:[#allocation2 + $0x3c0] sm:$0xff]  ;;  %v441_v50 = vpack.c.bf16 %v155_v43, %v153_v42  ;;  %v93_v52 = vld [vmem:[#allocation2 + $0x1e8] sm:$0xff] }
  0x3b   :  { %362 = vmatprep.subr.bf16.mxu1 %v361_v60  ;;  %v154_v51 = vld [vmem:[#allocation2 + $0x3d0] sm:$0xff]  ;;  %v95_v53 = vld [vmem:[#allocation2 + $0x1f8] sm:$0xff]  ;;  %v157_v54 = vld [vmem:[#allocation2 + $0x3e8] sm:$0xff]  ;;  %v379_v56 = vpack.c.bf16 %v90_v48, %v88_v47 }
  0x3c   :  { %424 = vmatpush1.bf16.msra.mxu0 %v423_v59  ;;  %v159_v55 = vld [vmem:[#allocation2 + $0x3f8] sm:$0xff]  ;;  %v443_v57 = vpack.c.bf16 %v154_v51, %v152_v49  ;;  %v381_v58 = vpack.c.bf16 %v95_v53, %v93_v52  ;;  %v92_v59 = vld [vmem:[#allocation2 + $0x1e0] sm:$0xff]  ;;  %v94_v60 = vld [vmem:[#allocation2 + $0x1f0] sm:$0xff] }
  0x3d   :  { %426 = vmatprep.subr.bf16.mxu0 %v425_v0  ;;  %v445_v61 = vpack.c.bf16 %v159_v55, %v157_v54  ;;  %v156_v62 = vld [vmem:[#allocation2 + $0x3e0] sm:$0xff]  ;;  %v158_v63 = vld [vmem:[#allocation2 + $0x3f0] sm:$0xff]  ;;  %v383_v0 = vpack.c.bf16 %v94_v60, %v92_v59 }
  0x3e   :  { %364 = vmatpush1.bf16.msra.mxu1 %v363_v6  ;;  %v447_v1 = vpack.c.bf16 %v158_v63, %v156_v62  ;;  %v28_v2 = vld [vmem:[%s536_s0] sm:$0xff]  ;;  %v30_v3 = vld [vmem:[%s536_s0 + $0x10] sm:$0xff]  ;;  %v164_v6 = vsub.s32 0, %v163_v5 }
  0x3f   :  { %366 = vmatprep.subr.bf16.mxu1 %v365_v9  ;;  %v160_v7 = vld [vmem:[%s538_s2] sm:$0x3] }
  0x40   :  { %428 = vmatpush1.bf16.msra.mxu0 %v427_v8  ;;  %v168_v8 = vsub.s32 1, %v163_v5  ;;  %v165_v9 = vrot.slane %v160_v7, %v164_v6 }
  0x41   :  { %430 = vmatprep.subr.bf16.mxu0 %v429_v13 }
  0x42   :  { %368 = vmatpush1.bf16.msra.mxu1 %v367_v20  ;;  %v169_v10 = vrot.slane %v160_v7, %v168_v8 }
  0x43   :  { %370 = vmatprep.subr.bf16.mxu1 %v369_v22 }
  0x44   :  { %432 = vmatpush1.bf16.msra.mxu0 %v431_v21 }
  0x45   :  { %434 = vmatprep.subr.bf16.mxu0 %v433_v26 }
  0x46   :  { %372 = vmatpush1.bf16.msra.mxu1 %v371_v32 }
  0x47   :  { %374 = vmatprep.subr.bf16.mxu1 %v373_v34 }
  0x48   :  { %436 = vmatpush1.bf16.msra.mxu0 %v435_v33 }
  0x49   :  { %438 = vmatprep.subr.bf16.mxu0 %v437_v38 }
  0x4a   :  { %376 = vmatpush1.bf16.msra.mxu1 %v375_v44 }
  0x4b   :  { %378 = vmatprep.subr.bf16.mxu1 %v377_v46 }
  0x4c   :  { %440 = vmatpush1.bf16.msra.mxu0 %v439_v45 }
  0x4d   :  { %442 = vmatprep.subr.bf16.mxu0 %v441_v50 }
  0x4e   :  { %380 = vmatpush1.bf16.msra.mxu1 %v379_v56 }
  0x4f   :  { %382 = vmatprep.subr.bf16.mxu1 %v381_v58 }
  0x50   :  { %444 = vmatpush1.bf16.msra.mxu0 %v443_v57 }
  0x51   :  { %446 = vmatprep.subr.bf16.mxu0 %v445_v61 }
  0x52   :  { %384 = vmatpush1.bf16.msra.mxu1 %v383_v0 }
  0x54   :  { %448 = vmatpush1.bf16.msra.mxu0 %v447_v1 }
  0x55   :  { %237 = vmatmul.mubr.f32.vlgmr.msra.gmra.mrb[0].mxu1 %v28_v2 }
  0x57   :  { %308 = vmatmul.mubr.f32.vlgmr.msra.gmra.mrb[0].mxu0 %v30_v3 }
 0x128   :  { %v238_v11 = vpop.f32.mrb[0].mxu1 }
 0x129   :  { %v239_v12 = vadd.f32 %v238_v11, %v165_v9  ;;  %v240_v13 = vpop.f32.mrb[1].mxu1 }
 0x12a   :  { %v309_v14 = vpop.f32.mrb[0].mxu0  ;;  %v241_v15 = vadd.f32 %v240_v13, %v169_v10 }
 0x12b   :  { %v311_v16 = vpop.f32.mrb[1].mxu0  ;;  %v310_v17 = vadd.f32 %v309_v14, %v239_v12 }
 0x12c   :  { %v312_v18 = vadd.f32 %v311_v16, %v241_v15 }
 0x12d   :  { %314 = vst [vmem:[%s539_s3] sm:$0xff] %v310_v17 }
 0x12e   :  { %315 = vst [vmem:[%s539_s3 + $0x8] sm:$0xff] %v312_v18 }
 0x12f   :  { %320 = vsyncpa [#allocation3], 1 }

</bundles_post_ra>
